<compile_context>
chip_gen: v6e
topology: v6e:2x2x1
jax: 0.10.0
libtpu: 0.0.40
codegen_flags: <defaults>
</compile_context>

<pallas_src>
import jax
import jax.numpy as jnp
from jax.experimental import pallas as pl
from jax.experimental.pallas import tpu as pltpu

_LANE = 128                      # lane width (last dim / output stores)
_M_ALIGN = 16                    # sublane alignment for bf16 second-to-last dim
_TILE_CANDS_M = (512, 384, 256, 128, 64, 32, 16)
_TILE_CANDS_N = (512, 384, 256, 128)   # output lane dim: multiples of 128
_MAX_FULL_K = 2048               # collapse the K grid axis when D_p <= this


def _round_up(x, m):
    return (x + m - 1) // m * m


def _vmem_limit_bytes():
    """Generation-aware scoped-VMEM budget (~75% of physical, capped)."""
    try:
        cap = pltpu.get_tpu_info().vmem_capacity_bytes
    except Exception:  # pragma: no cover - robust if query is unavailable
        cap = 64 * 1024 * 1024   # conservative (v7x-sized) fallback
    return max(32 * 1024 * 1024, min(int(cap) * 3 // 4, 100 * 1024 * 1024))


def _best_tile(dim, candidates):
    """Pick the candidate tile minimizing padding (prefer larger on ties)."""
    best, best_waste = None, None
    for c in candidates:
        waste = _round_up(dim, c) - dim
        if best is None or waste < best_waste or (waste == best_waste and c > best):
            best, best_waste = c, waste
    return best


def _sim_kernel_fullk(im_ref, s_ref, o_ref):
    # One (tm, tn) output tile: im[tm, D] contracted with s[tn, D] on the last
    # (embedding) dim — the MXU consumes s in its natural layout, no transpose
    # materialized, f32 accumulation.
    o_ref[...] = jax.lax.dot_general(
        im_ref[...],
        s_ref[...],
        dimension_numbers=(((1,), (1,)), ((), ())),
        preferred_element_type=jnp.float32,
    )


def _sim_kernel_kgrid(im_ref, s_ref, o_ref):
    # Fallback for very large D: accumulate directly into the f32 output tile
    # (its block index is K-invariant, so it stays VMEM-resident across k).
    @pl.when(pl.program_id(2) == 0)
    def _():
        o_ref[...] = jnp.zeros_like(o_ref)

    o_ref[...] += jax.lax.dot_general(
        im_ref[...],
        s_ref[...],
        dimension_numbers=(((1,), (1,)), ((), ())),
        preferred_element_type=jnp.float32,
    )


def cosine_sim(im, s):
    """Similarity between all im / s pairs: im @ s.T (as in the PyTorch ref).

    Note: despite the name (kept from the reference), no L2 normalization is
    applied — this matches `im.mm(s.t())`.  Operands are cast to bfloat16 for
    the MXU; accumulation stays in float32.
    """
    n, d = im.shape
    m, d2 = s.shape
    assert d == d2, "embedding dims must match"

    # bf16 operands (MXU-native on v5e/v6e/v7x), f32 accumulation in the MXU.
    im = im.astype(jnp.bfloat16)
    s = s.astype(jnp.bfloat16)

    # Padding-aware tile selection.
    tm = _best_tile(max(n, _M_ALIGN), _TILE_CANDS_M)
    tn = _best_tile(max(m, _LANE), _TILE_CANDS_N)
    n_p = _round_up(n, tm)
    m_p = _round_up(m, tn)

    # v7x has two TensorCores: ensure >= 2 parallel blocks when splittable.
    if (n_p // tm) * (m_p // tn) < 2 and tm >= 2 * _M_ALIGN and n > _M_ALIGN:
        tm = _round_up(tm // 2, _M_ALIGN)
        n_p = _round_up(n, tm)

    d_lane = _round_up(d, _LANE)
    full_k = d_lane <= _MAX_FULL_K
    tk = d_lane if full_k else 512
    d_p = _round_up(d, tk)

    # Zero-pad to tile boundaries (zeros contribute nothing to dot products).
    im_p = im if (n_p == n and d_p == d) else jnp.pad(
        im, ((0, n_p - n), (0, d_p - d)))
    s_p = s if (m_p == m and d_p == d) else jnp.pad(
        s, ((0, m_p - m), (0, d_p - d)))

    gi, gj, gk = n_p // tm, m_p // tn, d_p // tk
    elem = 2  # bf16 operand bytes
    if full_k:
        # im tile is j-invariant (read once per i-row); s streamed per i-row.
        bytes_accessed = elem * (n_p * d_p + m_p * d_p * gi) + 4 * n_p * m_p
    else:
        bytes_accessed = elem * (n_p * d_p * gj + m_p * d_p * gi) + 4 * n_p * m_p

    cost = pl.CostEstimate(
        flops=2 * n_p * m_p * d_p,
        transcendentals=0,
        bytes_accessed=bytes_accessed,
    )
    params = pltpu.CompilerParams(
        dimension_semantics=(("parallel", "parallel") if full_k
                             else ("parallel", "parallel", "arbitrary")),
        vmem_limit_bytes=_vmem_limit_bytes(),
    )

    if full_k:
        grid = (gi, gj)
        in_specs = [
            pl.BlockSpec((tm, tk), lambda i, j: (i, 0)),  # im: j-invariant, stays resident
            pl.BlockSpec((tn, tk), lambda i, j: (j, 0)),  # s:  streamed along j
        ]
        out_specs = pl.BlockSpec((tm, tn), lambda i, j: (i, j))
        kernel = _sim_kernel_fullk
    else:
        grid = (gi, gj, gk)
        in_specs = [
            pl.BlockSpec((tm, tk), lambda i, j, k: (i, k)),
            pl.BlockSpec((tn, tk), lambda i, j, k: (j, k)),
        ]
        out_specs = pl.BlockSpec((tm, tn), lambda i, j, k: (i, j))
        kernel = _sim_kernel_kgrid

    out = pl.pallas_call(
        kernel,
        out_shape=jax.ShapeDtypeStruct((n_p, m_p), jnp.float32),
        grid_spec=pltpu.PrefetchScalarGridSpec(
            num_scalar_prefetch=0,
            grid=grid,
            in_specs=in_specs,
            out_specs=out_specs,
        ),
        compiler_params=params,
        cost_estimate=cost,
    )(im_p, s_p)

    if n_p != n or m_p != m:
        out = out[:n, :m]
    return out


class LossIntra:
    """JAX/Pallas port of the PyTorch Loss_intra module."""

    def __init__(self, opt=None):
        self.temp = 0.05
        self.opt = opt
        self.sim = cosine_sim
        # nn.CrossEntropyLoss has no parameters; nothing to initialize.

    def forward(self, cap_emb):
        # Matches the reference forward exactly: print shape, return 0.01.
        print(cap_emb.shape)
        # TODO(synk): the reference never computes the CE-over-(sim/temp) loss
        # (forward is a stub); when it is implemented, fuse temperature scaling
        # and the online row logsumexp/softmax-CE into the similarity kernel
        # (i parallel, j as the 'arbitrary' reduction) so the NxM matrix never
        # hits HBM.
        return 0.01

    def __call__(self, cap_emb):
        return self.forward(cap_emb)


if __name__ == "__main__":
    key = jax.random.PRNGKey(0)

    # Small shape consistent with the module: 8 caption embeddings, hidden=32.
    cap_emb = jax.random.normal(key, (8, 32), dtype=jnp.float32)

    # Module forward: identical semantics to the PyTorch stub.
    loss_mod = LossIntra(opt=None)
    out = loss_mod(cap_emb)
    assert out == 0.01

    def _bf16_ref(a, b):
        # Reference with matching (bf16 operand, f32 accumulate) numerics.
        return jnp.dot(a.astype(jnp.bfloat16), b.astype(jnp.bfloat16).T,
                       preferred_element_type=jnp.float32)

    # Exercise the Pallas similarity kernel (single-tile path) and check it.
    sim = cosine_sim(cap_emb, cap_emb)
    jax.block_until_ready(sim)
    assert jnp.allclose(sim, _bf16_ref(cap_emb, cap_emb), atol=1e-2, rtol=1e-2)
    assert jnp.allclose(sim, cap_emb @ cap_emb.T, atol=2e-1, rtol=5e-2)

    # Exercise the multi-tile / padded path (>=2 parallel blocks, padded N)
    # and check it too.
    k1, k2 = jax.random.split(jax.random.PRNGKey(0))
    im_big = jax.random.normal(k1, (384, 512), dtype=jnp.float32)
    s_big = jax.random.normal(k2, (300, 512), dtype=jnp.float32)
    sim_big = cosine_sim(im_big, s_big)
    jax.block_until_ready(sim_big)
    assert jnp.allclose(sim_big, _bf16_ref(im_big, s_big), atol=1e-2, rtol=1e-2)
    assert jnp.allclose(sim_big, im_big @ s_big.T, atol=1.0, rtol=5e-2)

    print("KERNEL_OK")
</pallas_src>

<mosaic_0001>
module attributes {stable_mosaic.version = 11 : i64} {
  func.func @_sim_kernel_fullk(%arg0: i32, %arg1: i32, %arg2: memref<16x128xbf16, #tpu.memory_space<vmem>>, %arg3: memref<128x128xbf16, #tpu.memory_space<vmem>>, %arg4: memref<16x128xf32, #tpu.memory_space<vmem>>) attributes {dimension_semantics = [#tpu.dimension_semantics<parallel>, #tpu.dimension_semantics<parallel>], iteration_bounds = array<i64: 1, 1>, scalar_prefetch = 0 : i64, scratch_operands = 0 : i64, tpu.core_type = #tpu.core_type<tc>, window_params = [{transform_indices = @transform_0, window_bounds = array<i64: 16, 128>}, {transform_indices = @transform_1, window_bounds = array<i64: 128, 128>}, {transform_indices = @transform_2, window_bounds = array<i64: 16, 128>}]} {
    %c0 = arith.constant 0 : index
    %c0_0 = arith.constant 0 : index
    %0 = vector.load %arg2[%c0, %c0_0] : memref<16x128xbf16, #tpu.memory_space<vmem>>, vector<16x128xbf16>
    %c0_1 = arith.constant 0 : index
    %c0_2 = arith.constant 0 : index
    %1 = vector.load %arg3[%c0_1, %c0_2] : memref<128x128xbf16, #tpu.memory_space<vmem>>, vector<128x128xbf16>
    %cst = arith.constant dense<0.000000e+00> : vector<16x128xf32>
    %2 = tpu.matmul %0, %1, %cst {dimension_numbers = #tpu.dot_dimension_numbers<[1], [1], [0], [0], [0, 0, 1, 0], [], []>} : vector<16x128xbf16>, vector<128x128xbf16>, vector<16x128xf32> -> vector<16x128xf32>
    %c0_3 = arith.constant 0 : index
    %c0_4 = arith.constant 0 : index
    %3 = vector.load %arg4[%c0_3, %c0_4] : memref<16x128xf32, #tpu.memory_space<vmem>>, vector<16x128xf32>
    tpu.vector_store %arg4[%c0_3, %c0_4], %2 {strides = array<i32>} : memref<16x128xf32, #tpu.memory_space<vmem>>, vector<16x128xf32>,
    return
  }
  func.func @transform_0(%arg0: i32, %arg1: i32) -> (i32, i32) {
    %c0_i32 = arith.constant 0 : i32
    %c0_i32_0 = arith.constant 0 : i32
    return %arg0, %c0_i32 : i32, i32
  }
  func.func @transform_1(%arg0: i32, %arg1: i32) -> (i32, i32) {
    %c0_i32 = arith.constant 0 : i32
    %c0_i32_0 = arith.constant 0 : i32
    return %arg1, %c0_i32 : i32, i32
  }
  func.func @transform_2(%arg0: i32, %arg1: i32) -> (i32, i32) {
    %c0_i32 = arith.constant 0 : i32
    return %arg0, %arg1 : i32, i32
  }
}

</mosaic_0001>

<bundles_post_ra>
// kernel: tpu_custom_call.1
= control target key start
LH: loop header
LB: loop body
LE: loop exit
PB: predicated region body
PF: predicated region fallthrough
CT: control target
= control target key end

     0   :  { %7 = vsyncpa [#allocation3], 0  ;;  %s329_s0 = inlined_call_operand.hbm [shape: bf16[16,128], index: 0, kind: input, shape index: {}]   ;;  %s330_s1 = inlined_call_operand.hbm [shape: bf16[128,128], index: 1, kind: input, shape index: {}]   ;;  %s331_s2 = inlined_call_operand.hbm [shape: f32[16,128], index: 2, kind: output, shape index: {}]  }
   0x1   :  { %8 = vsyncpa [#allocation6], 0 }
   0x2   :  { %9 = vsyncpa [#allocation4], 0  ;;  %s296_s9 = smov [#allocation2]  }
   0x3   :  { %s15_s10 = sshll.u32 %s296_s9, 4  ;;  %s16_s10 = int_to_ptr.vmem [resolvable:$true] %s15_s10 }
   0x4   :  { %s238_s11 = scalar_lea.vmem %s16_s10, 128  ;;  %p243_p1 = scmp.lt.s32.totalorder %s16_s10, %s16_s10 }
   0x5   :  { %p239_p0 = scmp.ne.s32.totalorder %s16_s10, %s238_s11  ;;  %p244_p2 = scmp.lt.s32.totalorder %s238_s11, %s238_s11 }
   0x7   :  { %p245_p3 = por %p244_p2, %p243_p1 }
   0x9   :  { %p246_p4 = pnand %p245_p3, %p239_p0 }
   0xb   :  { %249 = shalt.err (!%p246_p4)
}
   0xc   :  { %s297_s12 = smov 64   ;;  %s298_s13 = smov 4  }
   0xd   :  { %21 = dma.hbm_to_vmem [thread:$0]  %s329_s0, 128, %s16_s10, [#allocation3], %s297_s12, %s297_s12, %s298_s13  }
   0xe   :  { %s299_s16 = smov [#allocation5]  }
   0xf   :  { %s27_s17 = sshll.u32 %s299_s16, 4  ;;  %s28_s17 = int_to_ptr.vmem [resolvable:$true] %s27_s17 }
  0x10   :  { %s258_s18 = scalar_lea.vmem %s28_s17, 1024  ;;  %p263_p6 = scmp.lt.s32.totalorder %s28_s17, %s28_s17 }
  0x11   :  { %p259_p5 = scmp.ne.s32.totalorder %s28_s17, %s258_s18  ;;  %p264_p7 = scmp.lt.s32.totalorder %s258_s18, %s258_s18 }
  0x13   :  { %p265_p8 = por %p264_p7, %p263_p6 }
  0x15   :  { %p266_p9 = pnand %p265_p8, %p259_p5 }
  0x17   :  { %269 = shalt.err (!%p266_p9)
}
  0x18   :  { %33 = dma.hbm_to_vmem [thread:$0]  %s330_s1, 1024, %s28_s17, [#allocation6], %s297_s12, %s297_s12, %s298_s13  }
  0x19   :  { %290 = dma.done.wait [#allocation3], 128  }
  0x1a   :  { %291 = vsyncadd [#allocation3], 4294967168 }
  0x1b   :  { %292 = dma.done.wait [#allocation6], 1024  }
  0x1c   :  { %293 = vsyncadd [#allocation6], 4294966272  ;;  %v300_v0 = vmov 0.0   ;;  %vm301_vm0 = vmmov 0   ;;  %v221_v1 = vld [vmem:[#allocation5 + $0x38] sm:$0xff]   ;;  %v222_v2 = vld [vmem:[#allocation5 + $0x30] sm:$0xff]  }
  0x1d   :  { %192 = vmatprep.subr.bf16.mxu0 %v300_v0  ;;  %208 = vmatprep.mubr.msk.bf16.mxu0 %vm301_vm0, %v300_v0  ;;  %v223_v3 = vld [vmem:[#allocation5 + $0x28] sm:$0xff]   ;;  %v224_v4 = vld [vmem:[#allocation5 + $0x20] sm:$0xff]   ;;  %v225_v5 = vld [vmem:[#allocation5 + $0x18] sm:$0xff]   ;;  %s302_s0 = smov [#allocation7]  }
  0x1e   :  { %193 = vmatpush3.bf16.xpose.msra.mxu0 %v221_v1  ;;  %v226_v6 = vld [vmem:[#allocation5 + $0x10] sm:$0xff]   ;;  %v227_v7 = vld [vmem:[#allocation5 + $0x8] sm:$0xff]   ;;  %v228_v8 = vld [vmem:[#allocation5] sm:$0xff]   ;;  %s161_s1 = sshll.u32 %s302_s0, 4  ;;  %s162_s1 = int_to_ptr.vmem [resolvable:$true] %s161_s1 }
  0x1f   :  { %194 = vmatprep.subr.bf16.mxu0 %v300_v0  ;;  %v229_v9 = vld [vmem:[#allocation2] sm:$0xff]   ;;  %s270_s21 = scalar_lea.vmem %s162_s1, 256  ;;  %p275_p11 = scmp.lt.s32.totalorder %s162_s1, %s162_s1 }
  0x20   :  { %p271_p10 = scmp.ne.s32.totalorder %s162_s1, %s270_s21  ;;  %p276_p12 = scmp.lt.s32.totalorder %s270_s21, %s270_s21 }
  0x22   :  { %p277_p13 = por %p276_p12, %p275_p11 }
  0x24   :  { %p278_p0 = pnand %p277_p13, %p271_p10 }
  0x26   :  { %195 = vmatpush3.bf16.xpose.msra.mxu0 %v222_v2 }
  0x27   :  { %196 = vmatprep.subr.bf16.mxu0 %v300_v0 }
  0x2e   :  { %197 = vmatpush3.bf16.xpose.msra.mxu0 %v223_v3 }
  0x2f   :  { %198 = vmatprep.subr.bf16.mxu0 %v300_v0 }
  0x36   :  { %199 = vmatpush3.bf16.xpose.msra.mxu0 %v224_v4 }
  0x37   :  { %200 = vmatprep.subr.bf16.mxu0 %v300_v0 }
  0x3e   :  { %201 = vmatpush3.bf16.xpose.msra.mxu0 %v225_v5 }
  0x3f   :  { %202 = vmatprep.subr.bf16.mxu0 %v300_v0 }
  0x46   :  { %203 = vmatpush3.bf16.xpose.msra.mxu0 %v226_v6 }
  0x47   :  { %204 = vmatprep.subr.bf16.mxu0 %v300_v0 }
  0x4e   :  { %205 = vmatpush3.bf16.xpose.msra.mxu0 %v227_v7 }
  0x4f   :  { %206 = vmatprep.subr.bf16.mxu0 %v300_v0 }
  0x56   :  { %207 = vmatpush3.bf16.xpose.msra.mxu0 %v228_v8 }
  0x5d   :  { %209 = vmatmul.mubr.bf16.vlgmr.msra.gmra.mxu0 %v229_v9 }
 0x11d   :  { %v147_v10 = vpop.f32.mrf.mxu0 }
 0x11e   :  { %154 = vst [vmem:[#allocation7] sm:$0xff] %v147_v10 }
 0x11f   :  { %v210_v11 = vpop.f32.mrf.mxu0 }
 0x121   :  { %v150_v12 = vpop.f32.mrf.mxu0 }
 0x122   :  { %155 = vst [vmem:[#allocation7 + $0x8] sm:$0xff] %v150_v12 }
 0x123   :  { %v211_v13 = vpop.f32.mrf.mxu0 }
 0x124   :  { %281 = shalt.err (!%p278_p0)
}
 0x125   :  { %s303_s22 = smov 128   ;;  %s304_s23 = smov 8  }
 0x126   :  { %167 = dma.vmem_to_hbm [thread:$0]  %s162_s1, 256, %s331_s2, [#allocation4], %s303_s22, %s303_s22, %s304_s23  }
 0x127   :  { %294 = dma.done.wait [#allocation4], 256  }
 0x128   :  { %295 = vsyncadd [#allocation4], 4294967040 }
 0x129   :  { %171 = vsyncpa [#allocation3], 1 }
 0x12a   :  { %172 = vsyncpa [#allocation6], 1 }
 0x12b   :  { %173 = vsyncpa [#allocation4], 1 }

</bundles_post_ra>
